<compile_context>
chip_gen: v5e
topology: v5e:2x2
jax: 0.10.0
libtpu: 0.0.40
codegen_flags: <defaults>
</compile_context>

<pallas_src>
import math

import jax
import jax.numpy as jnp
from jax import lax
from jax.experimental import pallas as pl
from jax.experimental.pallas import tpu as pltpu


# ---- tiling targets --------------------------------------------------------
_TM_TARGET = 512      # output-tile rows   (multiple of 8)
_TN_TARGET = 1024     # output-tile cols   (multiple of 128 -> unmasked vst)
_TK_TARGET = 1024     # reduction tile     (multiple of 128)

# Worst-case double-buffered footprint with the caps above (f32 operands):
#   2*tm*tk*4 + 2*tn*tk*4 + 2*tm*tn*4 + tm*tn*4  ~= 18 MiB
# -> safe on v7x (64 MiB physical) and v5e/v6e (128 MiB physical).
_VMEM_BUDGET = 40 << 20       # hard cap for the working set
_VMEM_LIMIT_CAP = 48 << 20    # never request more scoped VMEM than this


def _round_up(x, m):
    return ((x + m - 1) // m) * m


def _footprint_bytes(tm, tn, tk, in_bytes, w_bytes, out_bytes):
    return (2 * tm * tk * in_bytes      # x tile, double-buffered
            + 2 * tn * tk * w_bytes     # weight tile, double-buffered
            + 2 * tm * tn * out_bytes   # output tile, double-buffered
            + tm * tn * 4)              # f32 accumulator scratch


def _linear_kernel(x_ref, w_ref, o_ref, acc_ref):
    """One (i, j, k) grid step of y = x @ w.T.

    x_ref: (tm, tk)   w_ref: (tn, tk)   o_ref: (tm, tn)   acc_ref: f32 (tm, tn)
    """
    @pl.when(pl.program_id(2) == 0)
    def _():
        acc_ref[...] = jnp.zeros_like(acc_ref)

    # Contract the last dims of both operands (x @ w.T).  Mosaic handles the
    # transposed-RHS orientation on the MXU, so the wrapper never materializes
    # a (K, N) copy of the weight in HBM.
    acc_ref[...] += lax.dot_general(
        x_ref[...], w_ref[...],
        dimension_numbers=(((1,), (1,)), ((), ())),
        preferred_element_type=jnp.float32,
    )

    @pl.when(pl.program_id(2) == pl.num_programs(2) - 1)
    def _():
        o_ref[...] = acc_ref[...].astype(o_ref.dtype)


def linear_forward(x, weight, *, compute_dtype=None):
    """y = x @ weight.T over the last axis (torch Linear semantics).

    x:       (..., in_features)
    weight:  (out_features, in_features)   -- torch Parameter layout, unchanged
    compute_dtype: optional (e.g. jnp.bfloat16) to cast operands for the MXU;
                   accumulation stays f32; default None keeps exact semantics.
    returns: (..., out_features) in x.dtype
    """
    *lead, k = x.shape
    n, k_w = weight.shape
    assert k == k_w, "in_features mismatch"

    m = 1
    for d in lead:
        m *= d
    x2d = x.reshape(m, k)
    w = weight                      # keep (N, K); no per-call transpose copy
    out_dtype = x.dtype

    if compute_dtype is not None:
        x2d = x2d.astype(compute_dtype)
        w = w.astype(compute_dtype)

    in_bytes = jnp.dtype(x2d.dtype).itemsize
    w_bytes = jnp.dtype(w.dtype).itemsize
    out_bytes = jnp.dtype(out_dtype).itemsize

    # ---- K tile: prefer configurations needing no zero-padding -------------
    if k <= _TK_TARGET:
        tk, k_pad = k, k            # block == full reduction dim (always legal)
    else:
        tk, k_pad = 0, k
        cand = (_TK_TARGET // 128) * 128
        while cand >= 128:          # largest 128-multiple that divides K
            if k % cand == 0:
                tk = cand
                break
            cand -= 128
        if tk == 0:
            # Rare: huge, non-128-divisible K.  Zero-pad the reduction axis
            # (required for correctness; padded zeros do not change the sum).
            tk = _TK_TARGET
            k_pad = _round_up(k, tk)

    # ---- M / N tiles: full dim when small, large aligned tiles otherwise ---
    tm = m if m <= _TM_TARGET else _TM_TARGET
    tn = n if n <= _TN_TARGET else _TN_TARGET

    # Guarantee >= 2 parallel output blocks so both v7x TensorCores get work.
    if pl.cdiv(m, tm) * pl.cdiv(n, tn) < 2:
        if n >= 256:
            tn = _round_up(-(-n // 2), 128)
        elif m >= 16:
            tm = _round_up(-(-m // 2), 8)

    # ---- VMEM guard (caps above already keep the footprint <= ~18 MiB) -----
    while _footprint_bytes(tm, tn, tk, in_bytes, w_bytes, out_bytes) > _VMEM_BUDGET:
        if tn >= 256 and tn % 256 == 0:
            tn //= 2
        elif tm >= 16 and tm % 16 == 0:
            tm //= 2
        elif tk >= 256 and tk % 256 == 0 and k_pad % (tk // 2) == 0:
            tk //= 2
        else:
            break

    # Zero-pad K only when unavoidable (M/N ragged edges are handled by Pallas:
    # out-of-bounds output writes are dropped, so no wrapper-side pad copies).
    if k_pad != k:
        x2d = jnp.pad(x2d, ((0, 0), (0, k_pad - k)))
        w = jnp.pad(w, ((0, 0), (0, k_pad - k)))

    grid_m = pl.cdiv(m, tm)
    grid_n = pl.cdiv(n, tn)
    grid_k = k_pad // tk
    grid = (grid_m, grid_n, grid_k)

    footprint = _footprint_bytes(tm, tn, tk, in_bytes, w_bytes, out_bytes)
    vmem_limit = int(min(_VMEM_LIMIT_CAP, max(32 << 20, footprint + (8 << 20))))

    cost = pl.CostEstimate(
        flops=2 * m * n * k,
        transcendentals=0,
        # Real HBM traffic including re-reads: x is re-read grid_n times,
        # the weight grid_m times, the output written once.
        bytes_accessed=(m * k * grid_n * in_bytes
                        + k * n * grid_m * w_bytes
                        + m * n * out_bytes),
    )

    out = pl.pallas_call(
        _linear_kernel,
        out_shape=jax.ShapeDtypeStruct((m, n), out_dtype),
        grid=grid,
        in_specs=[
            pl.BlockSpec((tm, tk), lambda i, j, kk: (i, kk)),
            pl.BlockSpec((tn, tk), lambda i, j, kk: (j, kk)),
        ],
        out_specs=pl.BlockSpec((tm, tn), lambda i, j, kk: (i, j)),
        scratch_shapes=[pltpu.VMEM((tm, tn), jnp.float32)],
        compiler_params=pltpu.CompilerParams(
            dimension_semantics=("parallel", "parallel", "arbitrary"),
            vmem_limit_bytes=vmem_limit,
        ),
        cost_estimate=cost,
    )(x2d, w)

    return out.reshape(*lead, n)


def init_linear_weight(key, in_features, out_features, dtype=jnp.float32):
    """Mirrors the reference torch init exactly:
    std = 2/(in+out); sigma = sqrt(std);
    trunc_normal_(W, mean=0, std=std, a=-3*sigma, b=3*sigma)."""
    std = 2.0 / (in_features + out_features)
    sigma = math.sqrt(std)
    lower = -3.0 * sigma / std
    upper = 3.0 * sigma / std
    w = (
        jax.random.truncated_normal(
            key, lower, upper, shape=(out_features, in_features), dtype=jnp.float32
        )
        * std
    )
    return w.astype(dtype)


if __name__ == "__main__":
    key = jax.random.PRNGKey(0)
    k_w, k_x = jax.random.split(key)

    batch, seq, in_features, out_features = 2, 8, 32, 16

    weight = init_linear_weight(k_w, in_features, out_features)
    x = jax.random.normal(k_x, (batch, seq, in_features), dtype=jnp.float32)

    y = linear_forward(x, weight)
    y = jax.block_until_ready(y)

    # Reference check against plain JAX einsum (same semantics as the torch module).
    y_ref = jnp.einsum("...ij,kj->...ik", x, weight)
    assert y.shape == (batch, seq, out_features)
    assert jnp.allclose(y, y_ref, atol=1e-4, rtol=1e-4)

    print("KERNEL_OK")
</pallas_src>

<mosaic_0001>
module attributes {stable_mosaic.version = 11 : i64} {
  func.func @_linear_kernel(%arg0: i32, %arg1: i32, %arg2: i32, %arg3: memref<8x32xf32, #tpu.memory_space<vmem>>, %arg4: memref<16x32xf32, #tpu.memory_space<vmem>>, %arg5: memref<8x16xf32, #tpu.memory_space<vmem>>, %arg6: memref<8x16xf32, #tpu.memory_space<vmem>>) attributes {dimension_semantics = [#tpu.dimension_semantics<parallel>, #tpu.dimension_semantics<parallel>, #tpu.dimension_semantics<arbitrary>], iteration_bounds = array<i64: 2, 1, 1>, scalar_prefetch = 0 : i64, scratch_operands = 1 : i64, tpu.core_type = #tpu.core_type<tc>, window_params = [{transform_indices = @transform_0, window_bounds = array<i64: 8, 32>}, {transform_indices = @transform_1, window_bounds = array<i64: 16, 32>}, {transform_indices = @transform_2, window_bounds = array<i64: 8, 16>}]} {
    %c0_i32 = arith.constant 0 : i32
    %0 = arith.cmpi eq, %arg2, %c0_i32 : i32
    %1 = arith.extui %0 : i1 to i32
    %c0_i32_0 = arith.constant 0 : i32
    %2 = arith.cmpi ne, %1, %c0_i32_0 : i32
    scf.if %2 {
      %cst_10 = arith.constant 0.000000e+00 : f32
      %12 = vector.broadcast %cst_10 : f32 to vector<8x16xf32>
      %c0_11 = arith.constant 0 : index
      %c0_12 = arith.constant 0 : index
      %13 = vector.load %arg6[%c0_11, %c0_12] : memref<8x16xf32, #tpu.memory_space<vmem>>, vector<8x16xf32>
      tpu.vector_store %arg6[%c0_11, %c0_12], %12 {strides = array<i32>} : memref<8x16xf32, #tpu.memory_space<vmem>>, vector<8x16xf32>,
    } else {
    }
    %c0 = arith.constant 0 : index
    %c0_1 = arith.constant 0 : index
    %3 = vector.load %arg6[%c0, %c0_1] : memref<8x16xf32, #tpu.memory_space<vmem>>, vector<8x16xf32>
    %c0_2 = arith.constant 0 : index
    %c0_3 = arith.constant 0 : index
    %4 = vector.load %arg3[%c0_2, %c0_3] : memref<8x32xf32, #tpu.memory_space<vmem>>, vector<8x32xf32>
    %c0_4 = arith.constant 0 : index
    %c0_5 = arith.constant 0 : index
    %5 = vector.load %arg4[%c0_4, %c0_5] : memref<16x32xf32, #tpu.memory_space<vmem>>, vector<16x32xf32>
    %cst = arith.constant dense<0.000000e+00> : vector<8x16xf32>
    %6 = tpu.matmul %4, %5, %cst {dimension_numbers = #tpu.dot_dimension_numbers<[1], [1], [0], [0], [0, 0, 1, 0], [], []>} : vector<8x32xf32>, vector<16x32xf32>, vector<8x16xf32> -> vector<8x16xf32>
    %7 = arith.addf %3, %6 : vector<8x16xf32>
    %c0_6 = arith.constant 0 : index
    %c0_7 = arith.constant 0 : index
    %8 = vector.load %arg6[%c0_6, %c0_7] : memref<8x16xf32, #tpu.memory_space<vmem>>, vector<8x16xf32>
    tpu.vector_store %arg6[%c0_6, %c0_7], %7 {strides = array<i32>} : memref<8x16xf32, #tpu.memory_space<vmem>>, vector<8x16xf32>,
    %c0_i32_8 = arith.constant 0 : i32
    %9 = arith.cmpi eq, %arg2, %c0_i32_8 : i32
    %10 = arith.extui %9 : i1 to i32
    %c0_i32_9 = arith.constant 0 : i32
    %11 = arith.cmpi ne, %10, %c0_i32_9 : i32
    scf.if %11 {
      %c0_10 = arith.constant 0 : index
      %c0_11 = arith.constant 0 : index
      %12 = vector.load %arg6[%c0_10, %c0_11] : memref<8x16xf32, #tpu.memory_space<vmem>>, vector<8x16xf32>
      %c0_12 = arith.constant 0 : index
      %c0_13 = arith.constant 0 : index
      %13 = vector.load %arg5[%c0_12, %c0_13] : memref<8x16xf32, #tpu.memory_space<vmem>>, vector<8x16xf32>
      tpu.vector_store %arg5[%c0_12, %c0_13], %12 {strides = array<i32>} : memref<8x16xf32, #tpu.memory_space<vmem>>, vector<8x16xf32>,
    } else {
    }
    return
  }
  func.func @transform_0(%arg0: i32, %arg1: i32, %arg2: i32) -> (i32, i32) {
    %c0_i32 = arith.constant 0 : i32
    return %arg0, %arg2 : i32, i32
  }
  func.func @transform_1(%arg0: i32, %arg1: i32, %arg2: i32) -> (i32, i32) {
    %c0_i32 = arith.constant 0 : i32
    return %arg1, %arg2 : i32, i32
  }
  func.func @transform_2(%arg0: i32, %arg1: i32, %arg2: i32) -> (i32, i32) {
    %c0_i32 = arith.constant 0 : i32
    return %arg0, %arg1 : i32, i32
  }
}

</mosaic_0001>

<bundles_post_ra>
// kernel: tpu_custom_call.1
= control target key start
LH: loop header
LB: loop body
LE: loop exit
PB: predicated region body
PF: predicated region fallthrough
CT: control target
= control target key end

     0   :  { %7 = vsyncpa [#allocation4], 0  ;;  %s783_s0 = inlined_call_operand.hbm [shape: f32[16,32], index: 0, kind: input, shape index: {}]   ;;  %s784_s1 = inlined_call_operand.hbm [shape: f32[16,32], index: 1, kind: input, shape index: {}]   ;;  %s785_s2 = inlined_call_operand.hbm [shape: f32[16,16], index: 2, kind: output, shape index: {}]  }
   0x1   :  { %9 = vsyncpa [#allocation4 + $0x1], 0 }
   0x2   :  { %10 = vsyncpa [#allocation7], 0 }
   0x3   :  { %11 = vsyncpa [#allocation5], 0 }
   0x4   :  { %13 = vsyncpa [#allocation5 + $0x1], 0  ;;  %s637_s9 = smov 0   ;;  %s639_s10 = smov 0  }
   0x5   :  { %s641_s11 = smov 0   ;;  %s643_s12 = smov 0  }
   0x6   :  { %s645_s13 = smov 0   ;;  %s647_s14 = smov 0  }
   0x7 LB: > { %s376_s15 = sadd.s32 4294967295, %s616_s14   ;;  %p378_p0 = scmp.ge.s32.totalorder %s616_s14, 1  ;;  %s616_s14 = sphi %s647_s14, %s19_s14   ;;  %s612_s13 = sphi %s645_s13, %s796_s13   ;;  %s608_s12 = sphi %s643_s12, %s795_s12   ;;  %s604_s11 = sphi %s641_s11, %s794_s11   ;;  %s600_s10 = sphi %s639_s10, %s793_s10   ;;  %s596_s9 = sphi %s637_s9, %s792_s9  }
   0x8   : > { %p669_p1 = scmp.eq.s32.totalorder %s376_s15, 0  ;;  %p127_p2 = scmp.lt.s32.totalorder %s616_s14, 3 }
   0x9   : > { %s142_s19 = sshll.u32 %s784_s1, 4  ;;  %s618_s21 = smov [#allocation6]   ;;  %s143_s19 = int_to_ptr.hbm [resolvable:$true] %s142_s19 }
   0xa   : > { %p677_p3 = pnand %p378_p0, %p127_p2  ;;  %s144_s22 = sshll.u32 %s618_s21, 4  ;;  %s145_s22 = int_to_ptr.vmem [resolvable:$true] %s144_s22 }
   0xb   : > { %p380_p6 = scmp.ge.s32.totalorder %s616_s14, 2  ;;  %s619_s23 = smov 128  }
   0xc   : > { %p402_p4 = pneg %p677_p3  ;;  %s620_s24 = smov 8  }
   0xd   : > { %s377_s25 = sadd.s32 4294967294, %s616_s14   ;;  %s38_s26 = sadd.s32 1, %s612_s13 }
   0xe   : > { %p403_p5 = pnand %p402_p4, %p669_p1  ;;  %s47_s27 = sadd.s32 1, %s604_s11 }
   0xf   : > { %p40_p7 = scmp.ge.s32.totalorder %s38_s26, 2  ;;  %p54_p8 = scmp.ne.s32.totalorder %s604_s11, %s600_s10 }
  0x10   : > { %405 = dma.hbm_to_vmem [thread:$0]  (!%p403_p5), %s143_s19, 256, %s145_s22, [#allocation7], %s619_s23, %s619_s23, %s620_s24  }
  0x11   : > { %p55_p9 = scmp.eq.s32.totalorder %s616_s14, 0  ;;  %p60_p10 = scmp.ne.s32.totalorder %s600_s10, %s596_s9 }
  0x12   : > { %s798_s26 = smov (%p40_p7, %s38_s26), 0  ;;  %p114_p13 = scmp.eq.s32.totalorder %s376_s15, 1 }
  0x13   : > { %p696_p11 = por %p55_p9, %p54_p8  ;;  %p702_p12 = por %p669_p1, %p60_p10 }
  0x14   : > { %s42_s30 = ssub.s32 %s612_s13, %s798_s26  ;;  %p120_p2 = scmp.eq.s32.totalorder %s377_s25, 1 }
  0x15   : > { %p45_p0 = scmp.eq.s32.totalorder %s42_s30, 0  ;;  %p708_p4 = por %p114_p13, %p54_p8 }
  0x16   : > { %p415_p5 = scmp.lt.s32.totalorder %s616_s14, 2  ;;  %p716_p7 = por %p120_p2, %p60_p10 }
  0x17   : > { %s714_s4 = scalar_select %p45_p0, %s604_s11, %s47_s27  }
  0x18   : > { %s158_s6 = sand.u32 1, %s604_s11   ;;  %s382_s8 = sshll.u32 %s612_s13, 3 }
  0x19   : > { %s381_s7 = sshll.u32 %s158_s6, 3  ;;  %s167_s15 = scalar_lea.hbm %s783_s0, %s382_s8 }
  0x1a   : > { %s162_s19 = scalar_lea.vmem [#allocation3], %s381_s7  ;;  %s169_s22 = sshll.u32 %s167_s15, 4  ;;  %s170_s22 = int_to_ptr.hbm [resolvable:$true] %s169_s22 }
  0x1b   : > { %s171_s21 = sshll.u32 %s162_s19, 4  ;;  %p407_p8 = pnand %p415_p5, %p696_p11  ;;  %s172_s21 = int_to_ptr.vmem [resolvable:$true] %s171_s21 }
  0x1c   : > { %s159_s23 = scalar_lea.sflag [#allocation4], %s158_s6  ;;  %180 = sbr.rel (%p677_p3) target bundleno = 183 (0xb7), region = 28 }
  0x1d   : > { %409 = dma.hbm_to_vmem [thread:$0]  (!%p407_p8), %s170_s22, 128, %s172_s21, %s159_s23  }
  0x1e   : > { %s730_s24 = sand.u32 (!%p677_p3), 1, %s600_s10  }
  0x1f   : > { %s384_s25 = sshll.u32 (!%p677_p3), %s730_s24, 3  ;;  %s183_s27 = scalar_lea.sflag (!%p677_p3), [#allocation4], %s730_s24 }
  0x20   : > { %s186_s30 = scalar_lea.vmem (!%p677_p3), [#allocation3], %s384_s25 }
  0x21   : > { %583 = dma.done.wait (%p702_p12), %s183_s27, 128  }
  0x22   : > { %585 = vsyncadd (%p702_p12), %s183_s27, 4294967168 }
  0x23   : > { %587 = dma.done.wait (%p669_p1), [#allocation7], 256  }
  0x24   : > { %589 = vsyncadd (%p669_p1), [#allocation7], 4294967040  ;;  %vm218_vm0 = vcmask 130048   ;;  %v621_v0 = vmov 0.0   ;;  %vm224_vm1 = vcmask 261120   ;;  %v223_v1 = vld [vmem:[#allocation6 + $0x8] sm:$0xff] }
  0x25   : > { %219 = vst.msk [vmem:[#allocation2] sm:$0xff] %vm218_vm0, %v621_v0  ;;  %387 = vmatpush.xpose.msk.msra.mxu0 %vm224_vm1, %v223_v1  ;;  %v222_v2 = vld [vmem:[#allocation6] sm:$0xff]  ;;  %v221_v3 = vld [vmem:[%s186_s30] sm:$0xff]  ;;  %s391_s20 = sshll.u32 %s608_s12, 3  ;;  %s212_s6 = scalar_lea.vmem [#allocation8], %s384_s25 }
  0x26   : > { %s274_s29 = scalar_lea.hbm %s785_s2, %s391_s20  ;;  %s276_s7 = sshll.u32 %s212_s6, 4  ;;  %s277_s7 = int_to_ptr.vmem [resolvable:$true] %s276_s7 }
  0x27   : > { %s278_s8 = sshll.u32 %s274_s29, 4  ;;  %s263_s17 = scalar_lea.sflag [#allocation5], %s730_s24  ;;  %s279_s8 = int_to_ptr.hbm [resolvable:$true] %s278_s8 }
  0x28   : > { %s544_s18 = sshra.s32 %s279_s8, 4  ;;  %s550_s21 = scalar_lea.hbm %s785_s2, 16  ;;  %s545_s18 = int_to_ptr.hbm [resolvable:$true] %s544_s18 }
  0x29   : > { %388 = vmatpush.xpose.msk.msra.mxu0 %vm224_vm1, %v222_v2  ;;  %s546_s12 = scalar_lea.hbm %s545_s18, 8  ;;  %p551_p10 = scmp.lt.s32.totalorder %s545_s18, %s785_s2 }
  0x2a   : > { %p547_p1 = scmp.ne.s32.totalorder %s545_s18, %s546_s12  ;;  %p552_p11 = scmp.lt.s32.totalorder %s550_s21, %s546_s12 }
  0x2c   : > { %389 = vmatmul.msk.f32.vlgmr.msra.gmra.mxu0 %vm224_vm1, %v221_v3  ;;  %v220_v4 = vld [vmem:[#allocation2] sm:$0xff]  ;;  %p548_p3 = pnand %p547_p1, %p708_p4  ;;  %p553_p12 = por %p552_p11, %p551_p10 }
  0x2e   : > { %p549_p9 = pneg %p548_p3 }
  0x30   : > { %p554_p13 = pnand %p553_p12, %p549_p9 }
  0xa9   : > { %v251_v5 = vpop.f32.mrf.mxu0 }
  0xaa   : > { %v254_v6 = vadd.f32 %v251_v5, %v220_v4 }
  0xac   : > { %256 = vst.msk [vmem:[#allocation2] sm:$0xff] %vm218_vm0, %v254_v6 }
  0xb3   : > { %v260_v7 = vld [vmem:[#allocation2] sm:$0xff] }
  0xb4   : > { %261 = vst.msk [vmem:[%s212_s6] sm:$0xff] %vm218_vm0, %v260_v7 }
  0xb5   : > { %557 = shalt.err (!%p554_p13)
}
  0xb6   : > { %400 = dma.vmem_to_hbm [thread:$0]  (%p708_p4), %s277_s7, 128, %s279_s8, %s263_s17  }
  0xb7 PF: > { %s290_s24 = sand.u32 1, %s596_s9   ;;  %p411_p0 = pnand %p380_p6, %p716_p7 }
  0xb8   : > { %s291_s25 = scalar_lea.sflag [#allocation5], %s290_s24 }
  0xb9   : > { %p412_p2 = pneg %p411_p0 }
  0xbb   : > { %591 = dma.done.wait (%p412_p2), %s291_s25, 128  }
  0xbc   : > { %593 = vsyncadd (%p412_p2), %s291_s25, 4294967168  ;;  %s19_s14 = sadd.s32 1, %s616_s14   ;;  %s792_s9 = smov %s600_s10 }
  0xbd   : > { %p16_p5 = scmp.ge.s32.totalorder %s19_s14, 4   ;;  %s793_s10 = smov %s604_s11 }
  0xbe   : > { %s794_s11 = smov %s714_s4  ;;  %s795_s12 = smov %s612_s13 }
  0xbf   : > { %s796_s13 = smov %s798_s26  ;;  %18 = sbr.rel (!%p16_p5) target bundleno = 7 (0x7), region = 86 }
  0xc4   :  { %297 = vsyncpa [#allocation4], 1 }
  0xc5   :  { %299 = vsyncpa [#allocation4 + $0x1], 1 }
  0xc6   :  { %300 = vsyncpa [#allocation7], 1 }
  0xc7   :  { %301 = vsyncpa [#allocation5], 1 }
  0xc8   :  { %303 = vsyncpa [#allocation5 + $0x1], 1 }

</bundles_post_ra>
